<compile_context>
chip_gen: v6e
topology: v6e:2x2x1
jax: 0.10.0
libtpu: 0.0.40
codegen_flags: <defaults>
</compile_context>

<pallas_src>
import jax
import jax.numpy as jnp
from jax import lax
from jax.experimental import pallas as pl
from jax.experimental.pallas import tpu as pltpu


def _round_up(x, m):
    return (x + m - 1) // m * m


def gemm_bn_relu_kernel(col_ref, w_ref, shift_ref, o_ref):
    """One aligned MXU contraction for the whole batch, fused BN-shift + ReLU.

    col_ref:   [M, Kp]     im2col slab (Kp = 128, zero-padded tail columns)
    w_ref:     [Kp, Cout]  HWIO-flattened conv weights with BN scale folded in
    shift_ref: [1, Cout]   BN shift (beta - mean * scale)
    o_ref:     [M, Cout]
    """
    acc = jnp.dot(col_ref[...], w_ref[...], preferred_element_type=jnp.float32)
    o_ref[...] = jnp.maximum(acc + shift_ref[...], 0.0).astype(o_ref.dtype)


def basic_conv2d(x_nchw, w_oihw, gamma, beta, running_mean, running_var,
                 *, eps=1e-3, stride=1, padding=1):
    """Matches BasicConv2d.forward (eval-mode BN). Input/output are NCHW."""
    n, cin, h, w = x_nchw.shape
    cout, _, kh, kw = w_oihw.shape
    hout = (h + 2 * padding - kh) // stride + 1
    wout = (w + 2 * padding - kw) // stride + 1
    m = n * hout * wout
    k = kh * kw * cin
    kp = _round_up(k, 128)            # pad contraction to a full lane tile

    f32 = jnp.float32

    # --- BatchNorm folding (eval mode): y = conv(x, W)*scale + shift ---------
    scale = gamma.astype(f32) / jnp.sqrt(running_var.astype(f32) + eps)
    shift = (beta.astype(f32) - running_mean.astype(f32) * scale).reshape(1, cout)
    w_hwio = (jnp.transpose(w_oihw, (2, 3, 1, 0)).astype(f32)
              * scale[None, None, None, :])
    w2 = w_hwio.reshape(k, cout)                       # (kh, kw, cin) flatten
    w2p = jnp.pad(w2, ((0, kp - k), (0, 0)))           # zero K rows: free on MXU

    # --- Layout plumbing in XLA (off the serial kernel path): ---------------
    #     NCHW -> NHWC, spatial zero-pad, im2col to one (M, Kp) slab.
    x_nhwc = jnp.transpose(x_nchw, (0, 2, 3, 1)).astype(f32)
    x_pad = jnp.pad(x_nhwc,
                    ((0, 0), (padding, padding), (padding, padding), (0, 0)))
    taps = []
    for i in range(kh):
        for j in range(kw):
            taps.append(x_pad[:, i:i + stride * (hout - 1) + 1:stride,
                              j:j + stride * (wout - 1) + 1:stride, :])
    cols = jnp.concatenate(taps, axis=-1)              # [N, Hout, Wout, KH*KW*Cin]
    cols = cols.reshape(m, k)                          # column order = (kh, kw, cin)
    cols = jnp.pad(cols, ((0, 0), (0, kp - k)))        # [M, Kp] lane-aligned

    flops = 2 * m * k * cout
    bytes_accessed = 4 * (cols.size + w2p.size + shift.size + m * cout)

    # Single grid step: everything fits VMEM with huge margin (~280 KB total),
    # so there is no pipelining to exploit and no per-step overhead to pay.
    out = pl.pallas_call(
        gemm_bn_relu_kernel,
        out_shape=jax.ShapeDtypeStruct((m, cout), f32),
        in_specs=[
            pl.BlockSpec(memory_space=pltpu.MemorySpace.VMEM),
            pl.BlockSpec(memory_space=pltpu.MemorySpace.VMEM),
            pl.BlockSpec(memory_space=pltpu.MemorySpace.VMEM),
        ],
        out_specs=pl.BlockSpec(memory_space=pltpu.MemorySpace.VMEM),
        cost_estimate=pl.CostEstimate(
            flops=flops, transcendentals=0, bytes_accessed=bytes_accessed),
    )(cols, w2p, shift)

    out_nhwc = out.reshape(n, hout, wout, cout)
    return jnp.transpose(out_nhwc, (0, 3, 1, 2))       # back to NCHW


def _reference(x_nchw, w_oihw, gamma, beta, running_mean, running_var,
               *, eps=1e-3, padding=1):
    """Pure-JAX reference reproducing the PyTorch forward (eval-mode BN)."""
    conv = lax.conv_general_dilated(
        x_nchw, w_oihw, window_strides=(1, 1),
        padding=((padding, padding), (padding, padding)),
        dimension_numbers=("NCHW", "OIHW", "NCHW"))
    scale = gamma / jnp.sqrt(running_var + eps)
    shift = beta - running_mean * scale
    bn = conv * scale[None, :, None, None] + shift[None, :, None, None]
    return jnp.maximum(bn, 0.0)


if __name__ == "__main__":
    # Module hyper-params for this synthetic instance:
    #   BasicConv2d(in_channels=4, out_channels=8, kernel_size=3, stride=1, padding=1)
    N, CIN, H, W = 2, 4, 16, 16
    COUT, KH, KW = 8, 3, 3

    key = jax.random.PRNGKey(0)
    kx, kw_, kg, kb, km, kv = jax.random.split(key, 6)

    x = jax.random.normal(kx, (N, CIN, H, W), dtype=jnp.float32)
    conv_w = jax.random.normal(kw_, (COUT, CIN, KH, KW), dtype=jnp.float32) * 0.1
    bn_gamma = 1.0 + 0.1 * jax.random.normal(kg, (COUT,), dtype=jnp.float32)
    bn_beta = 0.1 * jax.random.normal(kb, (COUT,), dtype=jnp.float32)
    bn_mean = 0.05 * jax.random.normal(km, (COUT,), dtype=jnp.float32)
    bn_var = jax.random.uniform(kv, (COUT,), minval=0.5, maxval=1.5,
                                dtype=jnp.float32)

    out = basic_conv2d(x, conv_w, bn_gamma, bn_beta, bn_mean, bn_var)
    out = jax.block_until_ready(out)

    ref = _reference(x, conv_w, bn_gamma, bn_beta, bn_mean, bn_var)
    assert out.shape == (N, COUT, H, W), out.shape
    assert jnp.allclose(out, ref, rtol=1e-4, atol=1e-4), \
        float(jnp.max(jnp.abs(out - ref)))

    print("KERNEL_OK")
</pallas_src>

<mosaic_0001>
module attributes {stable_mosaic.version = 11 : i64} {
  func.func @gemm_bn_relu_kernel(%arg0: memref<512x128xf32, #tpu.memory_space<vmem>>, %arg1: memref<128x8xf32, #tpu.memory_space<vmem>>, %arg2: memref<1x8xf32, #tpu.memory_space<vmem>>, %arg3: memref<512x8xf32, #tpu.memory_space<vmem>>) attributes {dimension_semantics = [], scalar_prefetch = 0 : i64, scratch_operands = 0 : i64, tpu.core_type = #tpu.core_type<tc>} {
    %c0 = arith.constant 0 : index
    %c0_0 = arith.constant 0 : index
    %0 = vector.load %arg0[%c0, %c0_0] : memref<512x128xf32, #tpu.memory_space<vmem>>, vector<512x128xf32>
    %c0_1 = arith.constant 0 : index
    %c0_2 = arith.constant 0 : index
    %1 = vector.load %arg1[%c0_1, %c0_2] : memref<128x8xf32, #tpu.memory_space<vmem>>, vector<128x8xf32>
    %cst = arith.constant dense<0.000000e+00> : vector<512x8xf32>
    %2 = tpu.matmul %0, %1, %cst {dimension_numbers = #tpu.dot_dimension_numbers<[1], [0], [0], [1], [0, 0, 1, 1], [], []>} : vector<512x128xf32>, vector<128x8xf32>, vector<512x8xf32> -> vector<512x8xf32>
    %c0_3 = arith.constant 0 : index
    %c0_4 = arith.constant 0 : index
    %3 = vector.load %arg2[%c0_3, %c0_4] : memref<1x8xf32, #tpu.memory_space<vmem>>, vector<1x8xf32>
    %4 = vector.broadcast %3 : vector<1x8xf32> to vector<512x8xf32>
    %5 = arith.addf %2, %4 : vector<512x8xf32>
    %cst_5 = arith.constant 0.000000e+00 : f32
    %6 = vector.broadcast %cst_5 : f32 to vector<512x8xf32>
    %7 = arith.maximumf %5, %6 : vector<512x8xf32>
    %c0_6 = arith.constant 0 : index
    %c0_7 = arith.constant 0 : index
    %8 = vector.load %arg3[%c0_6, %c0_7] : memref<512x8xf32, #tpu.memory_space<vmem>>, vector<512x8xf32>
    tpu.vector_store %arg3[%c0_6, %c0_7], %7 {strides = array<i32>} : memref<512x8xf32, #tpu.memory_space<vmem>>, vector<512x8xf32>,
    return
  }
}

</mosaic_0001>

<bundles_post_ra>
// kernel: tpu_custom_call.1
= control target key start
LH: loop header
LB: loop body
LE: loop exit
PB: predicated region body
PF: predicated region fallthrough
CT: control target
= control target key end

     0   :  { %8 = vsyncpa [#allocation3], 0  ;;  %s900_s12 = smov [#allocation2]   ;;  %s1299_s0 = inlined_call_operand.hbm [shape: f32[512,128], index: 0, kind: input, shape index: {}]   ;;  %s1300_s1 = inlined_call_operand.vmem [shape: f32[128,8], index: 1, kind: input, shape index: {}]   ;;  %s1301_s2 = inlined_call_operand.vmem [shape: f32[1,8], index: 2, kind: input, shape index: {}]   ;;  %s1302_s3 = inlined_call_operand.vmem [shape: f32[512,8], index: 3, kind: output, shape index: {}]  }
   0x1   :  { %s14_s13 = sshll.u32 %s900_s12, 4  ;;  %s15_s13 = int_to_ptr.vmem [resolvable:$true] %s14_s13 }
   0x2   :  { %s886_s14 = scalar_lea.vmem %s15_s13, 8192  ;;  %p891_p1 = scmp.lt.s32.totalorder %s15_s13, %s15_s13 }
   0x3   :  { %p887_p0 = scmp.ne.s32.totalorder %s15_s13, %s886_s14  ;;  %p892_p2 = scmp.lt.s32.totalorder %s886_s14, %s886_s14 }
   0x5   :  { %p893_p3 = por %p892_p2, %p891_p1 }
   0x7   :  { %p894_p4 = pnand %p893_p3, %p887_p0 }
   0x9   :  { %897 = shalt.err (!%p894_p4)
}
   0xa   :  { %s901_s15 = smov 128   ;;  %s902_s16 = smov 8  }
   0xb   :  { %20 = dma.hbm_to_vmem [thread:$0]  %s1299_s0, 8192, %s15_s13, [#allocation3], %s901_s15, %s901_s15, %s902_s16  }
   0xc   :  { %898 = dma.done.wait [#allocation3], 8192  }
   0xd   :  { %899 = vsyncadd [#allocation3], 4294959104  ;;  %v107_v0 = vld [vmem:[%s1300_s1 + $0x78] sm:$0xff]  ;;  %v106_v1 = vld [vmem:[%s1300_s1 + $0x70] sm:$0xff]  ;;  %vm564_vm0 = vcmask 64512  }
   0xe   :  { %715 = vmatprep.subr.mxu0 %v107_v0  ;;  %843 = vmatprep.subr.mxu1 %v107_v0  ;;  %v105_v2 = vld [vmem:[%s1300_s1 + $0x68] sm:$0xff]  ;;  %v104_v3 = vld [vmem:[%s1300_s1 + $0x60] sm:$0xff]  ;;  %v103_v4 = vld [vmem:[%s1300_s1 + $0x58] sm:$0xff] }
   0xf   :  { %716 = vmatpush3.msra.mxu0 %v107_v0  ;;  %859 = vmatpush3.msra.mxu1 %v107_v0  ;;  %v102_v5 = vld [vmem:[%s1300_s1 + $0x50] sm:$0xff]  ;;  %v101_v6 = vld [vmem:[%s1300_s1 + $0x48] sm:$0xff]  ;;  %v100_v7 = vld [vmem:[%s1300_s1 + $0x40] sm:$0xff] }
  0x10   :  { %717 = vmatprep.subr.mxu0 %v106_v1  ;;  %844 = vmatprep.subr.mxu1 %v106_v1  ;;  %v99_v8 = vld [vmem:[%s1300_s1 + $0x38] sm:$0xff]  ;;  %v98_v9 = vld [vmem:[%s1300_s1 + $0x30] sm:$0xff]  ;;  %v97_v10 = vld [vmem:[%s1300_s1 + $0x28] sm:$0xff] }
  0x11   :  { %718 = vmatpush3.msra.mxu0 %v106_v1  ;;  %860 = vmatpush3.msra.mxu1 %v106_v1  ;;  %v96_v11 = vld [vmem:[%s1300_s1 + $0x20] sm:$0xff]  ;;  %v95_v12 = vld [vmem:[%s1300_s1 + $0x18] sm:$0xff]  ;;  %v94_v13 = vld [vmem:[%s1300_s1 + $0x10] sm:$0xff] }
  0x12   :  { %719 = vmatprep.subr.mxu0 %v105_v2  ;;  %845 = vmatprep.subr.mxu1 %v105_v2  ;;  %v93_v14 = vld [vmem:[%s1300_s1 + $0x8] sm:$0xff]  ;;  %v92_v15 = vld [vmem:[%s1300_s1] sm:$0xff]  ;;  %v30_v20 = vld [vmem:[#allocation2 + $0x10] sm:$0xff] }
  0x13   :  { %720 = vmatpush3.msra.mxu0 %v105_v2  ;;  %861 = vmatpush3.msra.mxu1 %v105_v2  ;;  %v28_v16 = vld [vmem:[#allocation2] sm:$0xff]  ;;  %v29_v18 = vld [vmem:[#allocation2 + $0x8] sm:$0xff]  ;;  %v62_v21 = vld [vmem:[#allocation2 + $0x110] sm:$0xff] }
  0x14   :  { %721 = vmatprep.subr.mxu0 %v104_v3  ;;  %846 = vmatprep.subr.mxu1 %v104_v3  ;;  %v60_v17 = vld [vmem:[#allocation2 + $0x100] sm:$0xff]  ;;  %v61_v19 = vld [vmem:[#allocation2 + $0x108] sm:$0xff]  ;;  %v31_v22 = vld [vmem:[#allocation2 + $0x18] sm:$0xff] }
  0x15   :  { %722 = vmatpush3.msra.mxu0 %v104_v3  ;;  %862 = vmatpush3.msra.mxu1 %v104_v3  ;;  %v63_v23 = vld [vmem:[#allocation2 + $0x118] sm:$0xff]  ;;  %v32_v24 = vld [vmem:[#allocation2 + $0x20] sm:$0xff]  ;;  %v33_v26 = vld [vmem:[#allocation2 + $0x28] sm:$0xff] }
  0x16   :  { %723 = vmatprep.subr.mxu0 %v103_v4  ;;  %847 = vmatprep.subr.mxu1 %v103_v4  ;;  %v64_v25 = vld [vmem:[#allocation2 + $0x120] sm:$0xff]  ;;  %v65_v27 = vld [vmem:[#allocation2 + $0x128] sm:$0xff]  ;;  %v34_v28 = vld [vmem:[#allocation2 + $0x30] sm:$0xff] }
  0x17   :  { %724 = vmatpush3.msra.mxu0 %v103_v4  ;;  %863 = vmatpush3.msra.mxu1 %v103_v4  ;;  %v66_v29 = vld [vmem:[#allocation2 + $0x130] sm:$0xff]  ;;  %v35_v30 = vld [vmem:[#allocation2 + $0x38] sm:$0xff]  ;;  %v36_v32 = vld [vmem:[#allocation2 + $0x40] sm:$0xff] }
  0x18   :  { %725 = vmatprep.subr.mxu0 %v102_v5  ;;  %848 = vmatprep.subr.mxu1 %v102_v5  ;;  %v67_v31 = vld [vmem:[#allocation2 + $0x138] sm:$0xff]  ;;  %v68_v33 = vld [vmem:[#allocation2 + $0x140] sm:$0xff]  ;;  %v37_v34 = vld [vmem:[#allocation2 + $0x48] sm:$0xff] }
  0x19   :  { %726 = vmatpush3.msra.mxu0 %v102_v5  ;;  %864 = vmatpush3.msra.mxu1 %v102_v5  ;;  %v69_v35 = vld [vmem:[#allocation2 + $0x148] sm:$0xff]  ;;  %v38_v36 = vld [vmem:[#allocation2 + $0x50] sm:$0xff]  ;;  %v39_v38 = vld [vmem:[#allocation2 + $0x58] sm:$0xff] }
  0x1a   :  { %727 = vmatprep.subr.mxu0 %v101_v6  ;;  %849 = vmatprep.subr.mxu1 %v101_v6  ;;  %v70_v37 = vld [vmem:[#allocation2 + $0x150] sm:$0xff]  ;;  %v71_v39 = vld [vmem:[#allocation2 + $0x158] sm:$0xff]  ;;  %v40_v40 = vld [vmem:[#allocation2 + $0x60] sm:$0xff] }
  0x1b   :  { %728 = vmatpush3.msra.mxu0 %v101_v6  ;;  %865 = vmatpush3.msra.mxu1 %v101_v6  ;;  %v72_v41 = vld [vmem:[#allocation2 + $0x160] sm:$0xff]  ;;  %v41_v42 = vld [vmem:[#allocation2 + $0x68] sm:$0xff]  ;;  %v42_v44 = vld [vmem:[#allocation2 + $0x70] sm:$0xff] }
  0x1c   :  { %729 = vmatprep.subr.mxu0 %v100_v7  ;;  %850 = vmatprep.subr.mxu1 %v100_v7  ;;  %v73_v43 = vld [vmem:[#allocation2 + $0x168] sm:$0xff]  ;;  %v74_v45 = vld [vmem:[#allocation2 + $0x170] sm:$0xff]  ;;  %v43_v46 = vld [vmem:[#allocation2 + $0x78] sm:$0xff] }
  0x1d   :  { %730 = vmatpush3.msra.mxu0 %v100_v7  ;;  %866 = vmatpush3.msra.mxu1 %v100_v7  ;;  %v75_v47 = vld [vmem:[#allocation2 + $0x178] sm:$0xff]  ;;  %v44_v48 = vld [vmem:[#allocation2 + $0x80] sm:$0xff]  ;;  %v45_v50 = vld [vmem:[#allocation2 + $0x88] sm:$0xff] }
  0x1e   :  { %731 = vmatprep.subr.mxu0 %v99_v8  ;;  %851 = vmatprep.subr.mxu1 %v99_v8  ;;  %v76_v49 = vld [vmem:[#allocation2 + $0x180] sm:$0xff]  ;;  %v77_v51 = vld [vmem:[#allocation2 + $0x188] sm:$0xff]  ;;  %v46_v52 = vld [vmem:[#allocation2 + $0x90] sm:$0xff] }
  0x1f   :  { %732 = vmatpush3.msra.mxu0 %v99_v8  ;;  %867 = vmatpush3.msra.mxu1 %v99_v8  ;;  %v78_v53 = vld [vmem:[#allocation2 + $0x190] sm:$0xff]  ;;  %v47_v54 = vld [vmem:[#allocation2 + $0x98] sm:$0xff]  ;;  %v48_v56 = vld [vmem:[#allocation2 + $0xa0] sm:$0xff] }
  0x20   :  { %733 = vmatprep.subr.mxu0 %v98_v9  ;;  %852 = vmatprep.subr.mxu1 %v98_v9  ;;  %v79_v55 = vld [vmem:[#allocation2 + $0x198] sm:$0xff]  ;;  %v80_v57 = vld [vmem:[#allocation2 + $0x1a0] sm:$0xff]  ;;  %v49_v58 = vld [vmem:[#allocation2 + $0xa8] sm:$0xff] }
  0x21   :  { %734 = vmatpush3.msra.mxu0 %v98_v9  ;;  %868 = vmatpush3.msra.mxu1 %v98_v9  ;;  %v81_v59 = vld [vmem:[#allocation2 + $0x1a8] sm:$0xff]  ;;  %v50_v60 = vld [vmem:[#allocation2 + $0xb0] sm:$0xff]  ;;  %v51_v62 = vld [vmem:[#allocation2 + $0xb8] sm:$0xff] }
  0x22   :  { %735 = vmatprep.subr.mxu0 %v97_v10  ;;  %853 = vmatprep.subr.mxu1 %v97_v10  ;;  %v82_v61 = vld [vmem:[#allocation2 + $0x1b0] sm:$0xff]  ;;  %v83_v63 = vld [vmem:[#allocation2 + $0x1b8] sm:$0xff]  ;;  %v52_v0 = vld [vmem:[#allocation2 + $0xc0] sm:$0xff] }
  0x23   :  { %736 = vmatpush3.msra.mxu0 %v97_v10  ;;  %869 = vmatpush3.msra.mxu1 %v97_v10  ;;  %v84_v1 = vld [vmem:[#allocation2 + $0x1c0] sm:$0xff]  ;;  %v53_v2 = vld [vmem:[#allocation2 + $0xc8] sm:$0xff]  ;;  %v54_v4 = vld [vmem:[#allocation2 + $0xd0] sm:$0xff] }
  0x24   :  { %737 = vmatprep.subr.mxu0 %v96_v11  ;;  %854 = vmatprep.subr.mxu1 %v96_v11  ;;  %v85_v3 = vld [vmem:[#allocation2 + $0x1c8] sm:$0xff]  ;;  %v86_v5 = vld [vmem:[#allocation2 + $0x1d0] sm:$0xff]  ;;  %v55_v6 = vld [vmem:[#allocation2 + $0xd8] sm:$0xff] }
  0x25   :  { %738 = vmatpush3.msra.mxu0 %v96_v11  ;;  %870 = vmatpush3.msra.mxu1 %v96_v11  ;;  %v87_v7 = vld [vmem:[#allocation2 + $0x1d8] sm:$0xff]  ;;  %v56_v8 = vld [vmem:[#allocation2 + $0xe0] sm:$0xff]  ;;  %v57_v10 = vld [vmem:[#allocation2 + $0xe8] sm:$0xff] }
  0x26   :  { %739 = vmatprep.subr.mxu0 %v95_v12  ;;  %855 = vmatprep.subr.mxu1 %v95_v12  ;;  %v88_v9 = vld [vmem:[#allocation2 + $0x1e0] sm:$0xff]  ;;  %v89_v11 = vld [vmem:[#allocation2 + $0x1e8] sm:$0xff] }
  0x27   :  { %740 = vmatpush3.msra.mxu0 %v95_v12  ;;  %871 = vmatpush3.msra.mxu1 %v95_v12  ;;  %v58_v12 = vld [vmem:[#allocation2 + $0xf0] sm:$0xff] }
  0x28   :  { %741 = vmatprep.subr.mxu0 %v94_v13  ;;  %856 = vmatprep.subr.mxu1 %v94_v13 }
  0x29   :  { %742 = vmatpush3.msra.mxu0 %v94_v13  ;;  %872 = vmatpush3.msra.mxu1 %v94_v13  ;;  %v90_v13 = vld [vmem:[#allocation2 + $0x1f0] sm:$0xff] }
  0x2a   :  { %743 = vmatprep.subr.mxu0 %v93_v14  ;;  %857 = vmatprep.subr.mxu1 %v93_v14 }
  0x2b   :  { %744 = vmatpush3.msra.mxu0 %v93_v14  ;;  %873 = vmatpush3.msra.mxu1 %v93_v14  ;;  %v59_v14 = vld [vmem:[#allocation2 + $0xf8] sm:$0xff] }
  0x2c   :  { %745 = vmatprep.subr.mxu0 %v92_v15  ;;  %858 = vmatprep.subr.mxu1 %v92_v15 }
  0x2d   :  { %746 = vmatpush3.msra.mxu0 %v92_v15  ;;  %874 = vmatpush3.msra.mxu1 %v92_v15  ;;  %v91_v15 = vld [vmem:[#allocation2 + $0x1f8] sm:$0xff] }
  0x2e   :  { %747 = vmatprep.mubr.f32.mxu0 %v28_v16  ;;  %795 = vmatprep.mubr.f32.mxu1 %v60_v17  ;;  %v977_v16 = vld [vmem:[%s1301_s2] ss:$0 sm:$0xff] }
  0x2f   :  { %748 = vmatmul.mubr.f32.vlgmr.msra.gmra.mxu0 %v29_v18  ;;  %796 = vmatmul.mubr.f32.vlgmr.msra.gmra.mxu1 %v61_v19 }
  0x30   :  { %750 = vmatprep.mubr.f32.mxu0 %v30_v20  ;;  %798 = vmatprep.mubr.f32.mxu1 %v62_v21 }
  0x33   :  { %751 = vmatmul.mubr.f32.gmra.mxu0 %v31_v22  ;;  %799 = vmatmul.mubr.f32.gmra.mxu1 %v63_v23 }
  0x34   :  { %753 = vmatprep.mubr.f32.mxu0 %v32_v24  ;;  %801 = vmatprep.mubr.f32.mxu1 %v64_v25 }
  0x37   :  { %754 = vmatmul.mubr.f32.gmra.mxu0 %v33_v26  ;;  %802 = vmatmul.mubr.f32.gmra.mxu1 %v65_v27 }
  0x38   :  { %756 = vmatprep.mubr.f32.mxu0 %v34_v28  ;;  %804 = vmatprep.mubr.f32.mxu1 %v66_v29 }
  0x3b   :  { %757 = vmatmul.mubr.f32.gmra.mxu0 %v35_v30  ;;  %805 = vmatmul.mubr.f32.gmra.mxu1 %v67_v31 }
  0x3c   :  { %759 = vmatprep.mubr.f32.mxu0 %v36_v32  ;;  %807 = vmatprep.mubr.f32.mxu1 %v68_v33 }
  0x3f   :  { %760 = vmatmul.mubr.f32.gmra.mxu0 %v37_v34  ;;  %808 = vmatmul.mubr.f32.gmra.mxu1 %v69_v35 }
  0x40   :  { %762 = vmatprep.mubr.f32.mxu0 %v38_v36  ;;  %810 = vmatprep.mubr.f32.mxu1 %v70_v37 }
  0x43   :  { %763 = vmatmul.mubr.f32.gmra.mxu0 %v39_v38  ;;  %811 = vmatmul.mubr.f32.gmra.mxu1 %v71_v39 }
  0x44   :  { %765 = vmatprep.mubr.f32.mxu0 %v40_v40  ;;  %813 = vmatprep.mubr.f32.mxu1 %v72_v41 }
  0x47   :  { %766 = vmatmul.mubr.f32.gmra.mxu0 %v41_v42  ;;  %814 = vmatmul.mubr.f32.gmra.mxu1 %v73_v43 }
  0x48   :  { %768 = vmatprep.mubr.f32.mxu0 %v42_v44  ;;  %816 = vmatprep.mubr.f32.mxu1 %v74_v45 }
  0x4b   :  { %769 = vmatmul.mubr.f32.gmra.mxu0 %v43_v46  ;;  %817 = vmatmul.mubr.f32.gmra.mxu1 %v75_v47 }
  0x4c   :  { %771 = vmatprep.mubr.f32.mxu0 %v44_v48  ;;  %819 = vmatprep.mubr.f32.mxu1 %v76_v49 }
  0x4f   :  { %772 = vmatmul.mubr.f32.gmra.mxu0 %v45_v50  ;;  %820 = vmatmul.mubr.f32.gmra.mxu1 %v77_v51 }
  0x50   :  { %774 = vmatprep.mubr.f32.mxu0 %v46_v52  ;;  %822 = vmatprep.mubr.f32.mxu1 %v78_v53 }
  0x53   :  { %775 = vmatmul.mubr.f32.gmra.mxu0 %v47_v54  ;;  %823 = vmatmul.mubr.f32.gmra.mxu1 %v79_v55 }
  0x54   :  { %777 = vmatprep.mubr.f32.mxu0 %v48_v56  ;;  %825 = vmatprep.mubr.f32.mxu1 %v80_v57 }
  0x57   :  { %778 = vmatmul.mubr.f32.gmra.mxu0 %v49_v58  ;;  %826 = vmatmul.mubr.f32.gmra.mxu1 %v81_v59 }
  0x58   :  { %780 = vmatprep.mubr.f32.mxu0 %v50_v60  ;;  %828 = vmatprep.mubr.f32.mxu1 %v82_v61 }
  0x5b   :  { %781 = vmatmul.mubr.f32.gmra.mxu0 %v51_v62  ;;  %829 = vmatmul.mubr.f32.gmra.mxu1 %v83_v63 }
  0x5c   :  { %783 = vmatprep.mubr.f32.mxu0 %v52_v0  ;;  %831 = vmatprep.mubr.f32.mxu1 %v84_v1 }
  0x5f   :  { %784 = vmatmul.mubr.f32.gmra.mxu0 %v53_v2  ;;  %832 = vmatmul.mubr.f32.gmra.mxu1 %v85_v3 }
  0x60   :  { %786 = vmatprep.mubr.f32.mxu0 %v54_v4  ;;  %834 = vmatprep.mubr.f32.mxu1 %v86_v5 }
  0x63   :  { %787 = vmatmul.mubr.f32.gmra.mxu0 %v55_v6  ;;  %835 = vmatmul.mubr.f32.gmra.mxu1 %v87_v7 }
  0x64   :  { %789 = vmatprep.mubr.f32.mxu0 %v56_v8  ;;  %837 = vmatprep.mubr.f32.mxu1 %v88_v9 }
  0x67   :  { %790 = vmatmul.mubr.f32.gmra.mxu0 %v57_v10  ;;  %838 = vmatmul.mubr.f32.gmra.mxu1 %v89_v11 }
  0x68   :  { %792 = vmatprep.mubr.f32.mxu0 %v58_v12  ;;  %840 = vmatprep.mubr.f32.mxu1 %v90_v13 }
  0x6b   :  { %793 = vmatmul.mubr.f32.gmra.mxu0 %v59_v14  ;;  %841 = vmatmul.mubr.f32.gmra.mxu1 %v91_v15 }
  0xef   :  { %v749_v17 = vpop.f32.mrf.mxu0  ;;  %v797_v18 = vpop.f32.mrf.mxu1 }
  0xf0   :  { %v187_v19 = vadd.f32 %v749_v17, %v977_v16  ;;  %v347_v20 = vadd.f32 %v797_v18, %v977_v16 }
  0xf1   :  { %v181_v21 = vpop.f32.mrf.mxu0  ;;  %v341_v22 = vpop.f32.mrf.mxu1 }
  0xf2   :  { %v501_v23 = vmax.f32 %v187_v19, 0.0  ;;  %v533_v24 = vmax.f32 %v347_v20, 0.0  ;;  %v182_v25 = vadd.f32 %v977_v16, %v181_v21  ;;  %v342_v26 = vadd.f32 %v977_v16, %v341_v22 }
  0xf3   :  { %v752_v27 = vpop.f32.mrf.mxu0  ;;  %v800_v28 = vpop.f32.mrf.mxu1 }
  0xf4   :  { %566 = vst.msk [vmem:[%s1302_s3 + $0x8] sm:$0xff] %vm564_vm0, %v501_v23  ;;  %598 = vst.msk [vmem:[%s1302_s3 + $0x108] sm:$0xff] %vm564_vm0, %v533_v24  ;;  %v500_v29 = vmax.f32 %v182_v25, 0.0  ;;  %v532_v30 = vmax.f32 %v342_v26, 0.0  ;;  %v197_v31 = vadd.f32 %v752_v27, %v977_v16  ;;  %v357_v32 = vadd.f32 %v800_v28, %v977_v16 }
  0xf5   :  { %v191_v33 = vpop.f32.mrf.mxu0  ;;  %v351_v34 = vpop.f32.mrf.mxu1 }
  0xf6   :  { %565 = vst.msk [vmem:[%s1302_s3] sm:$0xff] %vm564_vm0, %v500_v29  ;;  %597 = vst.msk [vmem:[%s1302_s3 + $0x100] sm:$0xff] %vm564_vm0, %v532_v30  ;;  %v503_v35 = vmax.f32 %v197_v31, 0.0  ;;  %v535_v36 = vmax.f32 %v357_v32, 0.0  ;;  %v192_v37 = vadd.f32 %v977_v16, %v191_v33  ;;  %v352_v38 = vadd.f32 %v977_v16, %v351_v34 }
  0xf7   :  { %v755_v39 = vpop.f32.mrf.mxu0  ;;  %v803_v40 = vpop.f32.mrf.mxu1 }
  0xf8   :  { %568 = vst.msk [vmem:[%s1302_s3 + $0x18] sm:$0xff] %vm564_vm0, %v503_v35  ;;  %600 = vst.msk [vmem:[%s1302_s3 + $0x118] sm:$0xff] %vm564_vm0, %v535_v36  ;;  %v502_v41 = vmax.f32 %v192_v37, 0.0  ;;  %v534_v42 = vmax.f32 %v352_v38, 0.0  ;;  %v207_v43 = vadd.f32 %v755_v39, %v977_v16  ;;  %v367_v44 = vadd.f32 %v803_v40, %v977_v16 }
  0xf9   :  { %v201_v45 = vpop.f32.mrf.mxu0  ;;  %v361_v46 = vpop.f32.mrf.mxu1 }
  0xfa   :  { %567 = vst.msk [vmem:[%s1302_s3 + $0x10] sm:$0xff] %vm564_vm0, %v502_v41  ;;  %599 = vst.msk [vmem:[%s1302_s3 + $0x110] sm:$0xff] %vm564_vm0, %v534_v42  ;;  %v505_v47 = vmax.f32 %v207_v43, 0.0  ;;  %v537_v48 = vmax.f32 %v367_v44, 0.0  ;;  %v202_v49 = vadd.f32 %v977_v16, %v201_v45  ;;  %v362_v50 = vadd.f32 %v977_v16, %v361_v46 }
  0xfb   :  { %v758_v51 = vpop.f32.mrf.mxu0  ;;  %v806_v52 = vpop.f32.mrf.mxu1 }
  0xfc   :  { %570 = vst.msk [vmem:[%s1302_s3 + $0x28] sm:$0xff] %vm564_vm0, %v505_v47  ;;  %602 = vst.msk [vmem:[%s1302_s3 + $0x128] sm:$0xff] %vm564_vm0, %v537_v48  ;;  %v504_v53 = vmax.f32 %v202_v49, 0.0  ;;  %v536_v54 = vmax.f32 %v362_v50, 0.0  ;;  %v217_v55 = vadd.f32 %v758_v51, %v977_v16  ;;  %v377_v56 = vadd.f32 %v806_v52, %v977_v16 }
  0xfd   :  { %v211_v57 = vpop.f32.mrf.mxu0  ;;  %v371_v58 = vpop.f32.mrf.mxu1 }
  0xfe   :  { %569 = vst.msk [vmem:[%s1302_s3 + $0x20] sm:$0xff] %vm564_vm0, %v504_v53  ;;  %601 = vst.msk [vmem:[%s1302_s3 + $0x120] sm:$0xff] %vm564_vm0, %v536_v54  ;;  %v507_v59 = vmax.f32 %v217_v55, 0.0  ;;  %v539_v60 = vmax.f32 %v377_v56, 0.0  ;;  %v212_v61 = vadd.f32 %v977_v16, %v211_v57  ;;  %v372_v62 = vadd.f32 %v977_v16, %v371_v58 }
  0xff   :  { %v761_v63 = vpop.f32.mrf.mxu0  ;;  %v809_v0 = vpop.f32.mrf.mxu1 }
 0x100   :  { %572 = vst.msk [vmem:[%s1302_s3 + $0x38] sm:$0xff] %vm564_vm0, %v507_v59  ;;  %604 = vst.msk [vmem:[%s1302_s3 + $0x138] sm:$0xff] %vm564_vm0, %v539_v60  ;;  %v506_v1 = vmax.f32 %v212_v61, 0.0  ;;  %v538_v2 = vmax.f32 %v372_v62, 0.0  ;;  %v227_v3 = vadd.f32 %v761_v63, %v977_v16  ;;  %v387_v4 = vadd.f32 %v809_v0, %v977_v16 }
 0x101   :  { %v221_v5 = vpop.f32.mrf.mxu0  ;;  %v381_v6 = vpop.f32.mrf.mxu1 }
 0x102   :  { %571 = vst.msk [vmem:[%s1302_s3 + $0x30] sm:$0xff] %vm564_vm0, %v506_v1  ;;  %603 = vst.msk [vmem:[%s1302_s3 + $0x130] sm:$0xff] %vm564_vm0, %v538_v2  ;;  %v509_v7 = vmax.f32 %v227_v3, 0.0  ;;  %v541_v8 = vmax.f32 %v387_v4, 0.0  ;;  %v222_v9 = vadd.f32 %v977_v16, %v221_v5  ;;  %v382_v10 = vadd.f32 %v977_v16, %v381_v6 }
 0x103   :  { %v764_v11 = vpop.f32.mrf.mxu0  ;;  %v812_v12 = vpop.f32.mrf.mxu1 }
 0x104   :  { %574 = vst.msk [vmem:[%s1302_s3 + $0x48] sm:$0xff] %vm564_vm0, %v509_v7  ;;  %606 = vst.msk [vmem:[%s1302_s3 + $0x148] sm:$0xff] %vm564_vm0, %v541_v8  ;;  %v508_v13 = vmax.f32 %v222_v9, 0.0  ;;  %v540_v14 = vmax.f32 %v382_v10, 0.0  ;;  %v237_v15 = vadd.f32 %v764_v11, %v977_v16  ;;  %v397_v17 = vadd.f32 %v812_v12, %v977_v16 }
 0x105   :  { %v231_v18 = vpop.f32.mrf.mxu0  ;;  %v391_v19 = vpop.f32.mrf.mxu1 }
 0x106   :  { %573 = vst.msk [vmem:[%s1302_s3 + $0x40] sm:$0xff] %vm564_vm0, %v508_v13  ;;  %605 = vst.msk [vmem:[%s1302_s3 + $0x140] sm:$0xff] %vm564_vm0, %v540_v14  ;;  %v511_v20 = vmax.f32 %v237_v15, 0.0  ;;  %v543_v21 = vmax.f32 %v397_v17, 0.0  ;;  %v232_v22 = vadd.f32 %v977_v16, %v231_v18  ;;  %v392_v23 = vadd.f32 %v977_v16, %v391_v19 }
 0x107   :  { %v767_v24 = vpop.f32.mrf.mxu0  ;;  %v815_v25 = vpop.f32.mrf.mxu1 }
 0x108   :  { %576 = vst.msk [vmem:[%s1302_s3 + $0x58] sm:$0xff] %vm564_vm0, %v511_v20  ;;  %608 = vst.msk [vmem:[%s1302_s3 + $0x158] sm:$0xff] %vm564_vm0, %v543_v21  ;;  %v510_v26 = vmax.f32 %v232_v22, 0.0  ;;  %v542_v27 = vmax.f32 %v392_v23, 0.0  ;;  %v247_v28 = vadd.f32 %v767_v24, %v977_v16  ;;  %v407_v29 = vadd.f32 %v815_v25, %v977_v16 }
 0x109   :  { %v241_v30 = vpop.f32.mrf.mxu0  ;;  %v401_v31 = vpop.f32.mrf.mxu1 }
 0x10a   :  { %575 = vst.msk [vmem:[%s1302_s3 + $0x50] sm:$0xff] %vm564_vm0, %v510_v26  ;;  %607 = vst.msk [vmem:[%s1302_s3 + $0x150] sm:$0xff] %vm564_vm0, %v542_v27  ;;  %v513_v32 = vmax.f32 %v247_v28, 0.0  ;;  %v545_v33 = vmax.f32 %v407_v29, 0.0  ;;  %v242_v34 = vadd.f32 %v977_v16, %v241_v30  ;;  %v402_v35 = vadd.f32 %v977_v16, %v401_v31 }
 0x10b   :  { %v770_v36 = vpop.f32.mrf.mxu0  ;;  %v818_v37 = vpop.f32.mrf.mxu1 }
 0x10c   :  { %578 = vst.msk [vmem:[%s1302_s3 + $0x68] sm:$0xff] %vm564_vm0, %v513_v32  ;;  %610 = vst.msk [vmem:[%s1302_s3 + $0x168] sm:$0xff] %vm564_vm0, %v545_v33  ;;  %v512_v38 = vmax.f32 %v242_v34, 0.0  ;;  %v544_v39 = vmax.f32 %v402_v35, 0.0  ;;  %v257_v40 = vadd.f32 %v770_v36, %v977_v16  ;;  %v417_v41 = vadd.f32 %v818_v37, %v977_v16 }
 0x10d   :  { %v251_v42 = vpop.f32.mrf.mxu0  ;;  %v411_v43 = vpop.f32.mrf.mxu1 }
 0x10e   :  { %577 = vst.msk [vmem:[%s1302_s3 + $0x60] sm:$0xff] %vm564_vm0, %v512_v38  ;;  %609 = vst.msk [vmem:[%s1302_s3 + $0x160] sm:$0xff] %vm564_vm0, %v544_v39  ;;  %v515_v44 = vmax.f32 %v257_v40, 0.0  ;;  %v547_v45 = vmax.f32 %v417_v41, 0.0  ;;  %v252_v46 = vadd.f32 %v977_v16, %v251_v42  ;;  %v412_v47 = vadd.f32 %v977_v16, %v411_v43 }
 0x10f   :  { %v773_v48 = vpop.f32.mrf.mxu0  ;;  %v821_v49 = vpop.f32.mrf.mxu1 }
 0x110   :  { %580 = vst.msk [vmem:[%s1302_s3 + $0x78] sm:$0xff] %vm564_vm0, %v515_v44  ;;  %612 = vst.msk [vmem:[%s1302_s3 + $0x178] sm:$0xff] %vm564_vm0, %v547_v45  ;;  %v514_v50 = vmax.f32 %v252_v46, 0.0  ;;  %v546_v51 = vmax.f32 %v412_v47, 0.0  ;;  %v267_v52 = vadd.f32 %v773_v48, %v977_v16  ;;  %v427_v53 = vadd.f32 %v821_v49, %v977_v16 }
 0x111   :  { %v261_v54 = vpop.f32.mrf.mxu0  ;;  %v421_v55 = vpop.f32.mrf.mxu1 }
 0x112   :  { %579 = vst.msk [vmem:[%s1302_s3 + $0x70] sm:$0xff] %vm564_vm0, %v514_v50  ;;  %611 = vst.msk [vmem:[%s1302_s3 + $0x170] sm:$0xff] %vm564_vm0, %v546_v51  ;;  %v517_v56 = vmax.f32 %v267_v52, 0.0  ;;  %v549_v57 = vmax.f32 %v427_v53, 0.0  ;;  %v262_v58 = vadd.f32 %v977_v16, %v261_v54  ;;  %v422_v59 = vadd.f32 %v977_v16, %v421_v55 }
 0x113   :  { %v776_v60 = vpop.f32.mrf.mxu0  ;;  %v824_v61 = vpop.f32.mrf.mxu1 }
 0x114   :  { %582 = vst.msk [vmem:[%s1302_s3 + $0x88] sm:$0xff] %vm564_vm0, %v517_v56  ;;  %614 = vst.msk [vmem:[%s1302_s3 + $0x188] sm:$0xff] %vm564_vm0, %v549_v57  ;;  %v516_v62 = vmax.f32 %v262_v58, 0.0  ;;  %v548_v63 = vmax.f32 %v422_v59, 0.0  ;;  %v277_v0 = vadd.f32 %v776_v60, %v977_v16  ;;  %v437_v1 = vadd.f32 %v824_v61, %v977_v16 }
 0x115   :  { %v271_v2 = vpop.f32.mrf.mxu0  ;;  %v431_v3 = vpop.f32.mrf.mxu1 }
 0x116   :  { %581 = vst.msk [vmem:[%s1302_s3 + $0x80] sm:$0xff] %vm564_vm0, %v516_v62  ;;  %613 = vst.msk [vmem:[%s1302_s3 + $0x180] sm:$0xff] %vm564_vm0, %v548_v63  ;;  %v519_v4 = vmax.f32 %v277_v0, 0.0  ;;  %v551_v5 = vmax.f32 %v437_v1, 0.0  ;;  %v272_v6 = vadd.f32 %v977_v16, %v271_v2  ;;  %v432_v7 = vadd.f32 %v977_v16, %v431_v3 }
 0x117   :  { %v779_v8 = vpop.f32.mrf.mxu0  ;;  %v827_v9 = vpop.f32.mrf.mxu1 }
 0x118   :  { %584 = vst.msk [vmem:[%s1302_s3 + $0x98] sm:$0xff] %vm564_vm0, %v519_v4  ;;  %616 = vst.msk [vmem:[%s1302_s3 + $0x198] sm:$0xff] %vm564_vm0, %v551_v5  ;;  %v518_v10 = vmax.f32 %v272_v6, 0.0  ;;  %v550_v11 = vmax.f32 %v432_v7, 0.0  ;;  %v287_v12 = vadd.f32 %v779_v8, %v977_v16  ;;  %v447_v13 = vadd.f32 %v827_v9, %v977_v16 }
 0x119   :  { %v281_v14 = vpop.f32.mrf.mxu0  ;;  %v441_v15 = vpop.f32.mrf.mxu1 }
 0x11a   :  { %583 = vst.msk [vmem:[%s1302_s3 + $0x90] sm:$0xff] %vm564_vm0, %v518_v10  ;;  %615 = vst.msk [vmem:[%s1302_s3 + $0x190] sm:$0xff] %vm564_vm0, %v550_v11  ;;  %v521_v17 = vmax.f32 %v287_v12, 0.0  ;;  %v553_v18 = vmax.f32 %v447_v13, 0.0  ;;  %v282_v19 = vadd.f32 %v977_v16, %v281_v14  ;;  %v442_v20 = vadd.f32 %v977_v16, %v441_v15 }
 0x11b   :  { %v782_v21 = vpop.f32.mrf.mxu0  ;;  %v830_v22 = vpop.f32.mrf.mxu1 }
 0x11c   :  { %586 = vst.msk [vmem:[%s1302_s3 + $0xa8] sm:$0xff] %vm564_vm0, %v521_v17  ;;  %618 = vst.msk [vmem:[%s1302_s3 + $0x1a8] sm:$0xff] %vm564_vm0, %v553_v18  ;;  %v520_v23 = vmax.f32 %v282_v19, 0.0  ;;  %v552_v24 = vmax.f32 %v442_v20, 0.0  ;;  %v297_v25 = vadd.f32 %v782_v21, %v977_v16  ;;  %v457_v26 = vadd.f32 %v830_v22, %v977_v16 }
 0x11d   :  { %v291_v27 = vpop.f32.mrf.mxu0  ;;  %v451_v28 = vpop.f32.mrf.mxu1 }
 0x11e   :  { %585 = vst.msk [vmem:[%s1302_s3 + $0xa0] sm:$0xff] %vm564_vm0, %v520_v23  ;;  %617 = vst.msk [vmem:[%s1302_s3 + $0x1a0] sm:$0xff] %vm564_vm0, %v552_v24  ;;  %v523_v29 = vmax.f32 %v297_v25, 0.0  ;;  %v555_v30 = vmax.f32 %v457_v26, 0.0  ;;  %v292_v31 = vadd.f32 %v977_v16, %v291_v27  ;;  %v452_v32 = vadd.f32 %v977_v16, %v451_v28 }
 0x11f   :  { %v785_v33 = vpop.f32.mrf.mxu0  ;;  %v833_v34 = vpop.f32.mrf.mxu1 }
 0x120   :  { %588 = vst.msk [vmem:[%s1302_s3 + $0xb8] sm:$0xff] %vm564_vm0, %v523_v29  ;;  %620 = vst.msk [vmem:[%s1302_s3 + $0x1b8] sm:$0xff] %vm564_vm0, %v555_v30  ;;  %v522_v35 = vmax.f32 %v292_v31, 0.0  ;;  %v554_v36 = vmax.f32 %v452_v32, 0.0  ;;  %v307_v37 = vadd.f32 %v785_v33, %v977_v16  ;;  %v467_v38 = vadd.f32 %v833_v34, %v977_v16 }
 0x121   :  { %v301_v39 = vpop.f32.mrf.mxu0  ;;  %v461_v40 = vpop.f32.mrf.mxu1 }
 0x122   :  { %587 = vst.msk [vmem:[%s1302_s3 + $0xb0] sm:$0xff] %vm564_vm0, %v522_v35  ;;  %619 = vst.msk [vmem:[%s1302_s3 + $0x1b0] sm:$0xff] %vm564_vm0, %v554_v36  ;;  %v525_v41 = vmax.f32 %v307_v37, 0.0  ;;  %v557_v42 = vmax.f32 %v467_v38, 0.0  ;;  %v302_v43 = vadd.f32 %v977_v16, %v301_v39  ;;  %v462_v44 = vadd.f32 %v977_v16, %v461_v40 }
 0x123   :  { %v788_v45 = vpop.f32.mrf.mxu0  ;;  %v836_v46 = vpop.f32.mrf.mxu1 }
 0x124   :  { %590 = vst.msk [vmem:[%s1302_s3 + $0xc8] sm:$0xff] %vm564_vm0, %v525_v41  ;;  %622 = vst.msk [vmem:[%s1302_s3 + $0x1c8] sm:$0xff] %vm564_vm0, %v557_v42  ;;  %v524_v47 = vmax.f32 %v302_v43, 0.0  ;;  %v556_v48 = vmax.f32 %v462_v44, 0.0  ;;  %v317_v49 = vadd.f32 %v788_v45, %v977_v16  ;;  %v477_v50 = vadd.f32 %v836_v46, %v977_v16 }
 0x125   :  { %v311_v51 = vpop.f32.mrf.mxu0  ;;  %v471_v52 = vpop.f32.mrf.mxu1 }
 0x126   :  { %589 = vst.msk [vmem:[%s1302_s3 + $0xc0] sm:$0xff] %vm564_vm0, %v524_v47  ;;  %621 = vst.msk [vmem:[%s1302_s3 + $0x1c0] sm:$0xff] %vm564_vm0, %v556_v48  ;;  %v527_v53 = vmax.f32 %v317_v49, 0.0  ;;  %v559_v54 = vmax.f32 %v477_v50, 0.0  ;;  %v312_v55 = vadd.f32 %v977_v16, %v311_v51  ;;  %v472_v56 = vadd.f32 %v977_v16, %v471_v52 }
 0x127   :  { %v791_v57 = vpop.f32.mrf.mxu0  ;;  %v839_v58 = vpop.f32.mrf.mxu1 }
 0x128   :  { %592 = vst.msk [vmem:[%s1302_s3 + $0xd8] sm:$0xff] %vm564_vm0, %v527_v53  ;;  %624 = vst.msk [vmem:[%s1302_s3 + $0x1d8] sm:$0xff] %vm564_vm0, %v559_v54  ;;  %v526_v59 = vmax.f32 %v312_v55, 0.0  ;;  %v558_v60 = vmax.f32 %v472_v56, 0.0  ;;  %v327_v61 = vadd.f32 %v791_v57, %v977_v16  ;;  %v487_v62 = vadd.f32 %v839_v58, %v977_v16 }
 0x129   :  { %v321_v63 = vpop.f32.mrf.mxu0  ;;  %v481_v0 = vpop.f32.mrf.mxu1 }
 0x12a   :  { %591 = vst.msk [vmem:[%s1302_s3 + $0xd0] sm:$0xff] %vm564_vm0, %v526_v59  ;;  %623 = vst.msk [vmem:[%s1302_s3 + $0x1d0] sm:$0xff] %vm564_vm0, %v558_v60  ;;  %v529_v1 = vmax.f32 %v327_v61, 0.0  ;;  %v561_v2 = vmax.f32 %v487_v62, 0.0  ;;  %v322_v3 = vadd.f32 %v977_v16, %v321_v63  ;;  %v482_v4 = vadd.f32 %v977_v16, %v481_v0 }
 0x12b   :  { %v794_v5 = vpop.f32.mrf.mxu0  ;;  %v842_v6 = vpop.f32.mrf.mxu1 }
 0x12c   :  { %594 = vst.msk [vmem:[%s1302_s3 + $0xe8] sm:$0xff] %vm564_vm0, %v529_v1  ;;  %626 = vst.msk [vmem:[%s1302_s3 + $0x1e8] sm:$0xff] %vm564_vm0, %v561_v2  ;;  %v528_v7 = vmax.f32 %v322_v3, 0.0  ;;  %v560_v8 = vmax.f32 %v482_v4, 0.0  ;;  %v337_v9 = vadd.f32 %v794_v5, %v977_v16  ;;  %v497_v10 = vadd.f32 %v842_v6, %v977_v16 }
 0x12d   :  { %v331_v11 = vpop.f32.mrf.mxu0  ;;  %v491_v12 = vpop.f32.mrf.mxu1 }
 0x12e   :  { %593 = vst.msk [vmem:[%s1302_s3 + $0xe0] sm:$0xff] %vm564_vm0, %v528_v7  ;;  %625 = vst.msk [vmem:[%s1302_s3 + $0x1e0] sm:$0xff] %vm564_vm0, %v560_v8  ;;  %v531_v13 = vmax.f32 %v337_v9, 0.0  ;;  %v563_v14 = vmax.f32 %v497_v10, 0.0  ;;  %v332_v15 = vadd.f32 %v977_v16, %v331_v11  ;;  %v492_v17 = vadd.f32 %v977_v16, %v491_v12 }
 0x130   :  { %596 = vst.msk [vmem:[%s1302_s3 + $0xf8] sm:$0xff] %vm564_vm0, %v531_v13  ;;  %628 = vst.msk [vmem:[%s1302_s3 + $0x1f8] sm:$0xff] %vm564_vm0, %v563_v14  ;;  %v530_v18 = vmax.f32 %v332_v15, 0.0  ;;  %v562_v19 = vmax.f32 %v492_v17, 0.0 }
 0x132   :  { %595 = vst.msk [vmem:[%s1302_s3 + $0xf0] sm:$0xff] %vm564_vm0, %v530_v18  ;;  %627 = vst.msk [vmem:[%s1302_s3 + $0x1f0] sm:$0xff] %vm564_vm0, %v562_v19 }
 0x133   :  { %633 = vsyncpa [#allocation3], 1 }

</bundles_post_ra>
